<compile_context>
chip_gen: v6e
topology: v6e:2x2x1
jax: 0.10.0
libtpu: 0.0.40
codegen_flags: <defaults>
</compile_context>

<pallas_src>
import jax
import jax.numpy as jnp
from jax.experimental import pallas as pl
from jax.experimental.pallas import tpu as pltpu

FEAT_IN = 8      # packed [x(7), a(1)]
H = 128          # lane-dense hidden width (64/64 concat -> 128, others zero-padded)
OUT_W = 8        # output lane width (real q in column 0); full-array-dim exemption
TILE_B = 1024    # rows per grid step (multiple of 8); amortizes per-step overhead


def _round_up(n, m):
    return ((n + m - 1) // m) * m


def qvalue_kernel(z_ref, w1_ref, w23_ref, w4_ref, b123_ref, b4_ref, out_ref):
    z = z_ref[...]                                                      # (tb, 8)

    # fused fc_s / fc_a / concat  -> (tb, 128)
    h1 = jnp.dot(z, w1_ref[...], preferred_element_type=jnp.float32) + b123_ref[0]
    h1 = jnp.maximum(h1, 0.0)

    # fc2 (zero-padded to 128 out-lanes) + relu
    h2 = jnp.dot(h1, w23_ref[0], preferred_element_type=jnp.float32) + b123_ref[1]
    h2 = jnp.maximum(h2, 0.0)

    # fc3 (zero-padded) + relu
    h3 = jnp.dot(h2, w23_ref[1], preferred_element_type=jnp.float32) + b123_ref[2]
    h3 = jnp.maximum(h3, 0.0)

    # fc4: narrow (128 -> 8) output; real q lives in column 0, rest are zeros.
    out_ref[...] = (jnp.dot(h3, w4_ref[...], preferred_element_type=jnp.float32)
                    + b4_ref[...])


def init_params(key):
    """Deterministic init matching the nn.Linear shapes (stored as (in, out))."""
    def linear(k, fan_in, fan_out):
        kw, kb = jax.random.split(k)
        bound = 1.0 / jnp.sqrt(fan_in)
        w = jax.random.uniform(kw, (fan_in, fan_out), jnp.float32, -bound, bound)
        b = jax.random.uniform(kb, (1, fan_out), jnp.float32, -bound, bound)
        return w, b

    k1, k2, k3, k4, k5 = jax.random.split(key, 5)
    ws, bs = linear(k1, 7, 64)     # fc_s
    wa, ba = linear(k2, 1, 64)     # fc_a
    w2, b2 = linear(k3, 128, 64)   # fc2
    w3, b3 = linear(k4, 64, 32)    # fc3
    w4, b4 = linear(k5, 32, 1)     # fc4
    return dict(ws=ws, bs=bs, wa=wa, ba=ba,
                w2=w2, b2=b2, w3=w3, b3=b3, w4=w4, b4=b4)


def pack_params(p):
    """Host-side (zero runtime cost) packing into lane-dense, fused weights."""
    f32 = jnp.float32
    # Block-diagonal fusion of fc_s / fc_a / concat.
    W1 = (jnp.zeros((FEAT_IN, H), f32)
          .at[:7, :64].set(p["ws"])
          .at[7:8, 64:128].set(p["wa"]))
    b1 = jnp.concatenate([p["bs"], p["ba"]], axis=1)[0]                  # (128,)
    # Hidden layers zero-padded to 128 output lanes.
    W2 = jnp.zeros((H, H), f32).at[:, :64].set(p["w2"])
    b2 = jnp.zeros((H,), f32).at[:64].set(p["b2"][0])
    W3 = jnp.zeros((H, H), f32).at[:64, :32].set(p["w3"])
    b3 = jnp.zeros((H,), f32).at[:32].set(p["b3"][0])
    # Output narrowed to 8 lanes (column 0 is the real q).
    W4 = jnp.zeros((H, OUT_W), f32).at[:32, :1].set(p["w4"])
    b4 = jnp.zeros((1, OUT_W), f32).at[:, :1].set(p["b4"][:, :1])
    return dict(W1=W1, W23=jnp.stack([W2, W3]),                          # (2,128,128)
                W4=W4, B123=jnp.stack([b1, b2, b3]),                     # (3,128)
                b4=b4)


def qvalue_forward(x, a, packed, tile_b=TILE_B):
    """x: (B, 7) or (7,), a: (B, 1) or (1,).  Returns q: (B, 1) f32."""
    x2 = jnp.atleast_2d(jnp.asarray(x, jnp.float32))                     # (B, 7)
    a2 = jnp.atleast_2d(jnp.asarray(a, jnp.float32))                     # (B, 1)
    B = x2.shape[0]
    z = jnp.concatenate([x2, a2], axis=1)                                # (B, 8)

    # Tile sizing: multiple of 8, clamped to the (rounded) batch so tiny batches
    # don't pay for a huge mostly-padded tile.  When the whole batch fits in one
    # tile but there is enough work, split into 2 tiles so the "parallel" grid
    # axis can shard across v7x's two TensorCores (no-op on v5e/v6e).
    b_r = _round_up(B, 8)
    tb = min(_round_up(tile_b, 8), b_r)
    if b_r // tb < 2 and b_r >= 16:
        tb = _round_up(pl.cdiv(b_r, 2), 8)
    n_tiles = pl.cdiv(b_r, tb)
    B_pad = n_tiles * tb
    if B_pad != B:
        z = jnp.pad(z, ((0, B_pad - B), (0, 0)))

    const2 = lambda i: (0, 0)    # weights/biases stay VMEM-resident across grid steps
    const3 = lambda i: (0, 0, 0)

    flops = 2 * B_pad * (FEAT_IN * H + H * H + H * H + H * OUT_W)
    bytes_accessed = 4 * (B_pad * FEAT_IN + B_pad * OUT_W
                          + FEAT_IN * H + 2 * H * H + H * OUT_W + 3 * H + OUT_W)

    out = pl.pallas_call(
        qvalue_kernel,
        out_shape=jax.ShapeDtypeStruct((B_pad, OUT_W), jnp.float32),
        grid=(n_tiles,),
        in_specs=[
            pl.BlockSpec((tb, FEAT_IN), lambda i: (i, 0)),   # z tiles stream
            pl.BlockSpec((FEAT_IN, H), const2),              # W1   (8,128)
            pl.BlockSpec((2, H, H), const3),                 # W2,W3 stacked
            pl.BlockSpec((H, OUT_W), const2),                # W4   (128,8)
            pl.BlockSpec((3, H), const2),                    # b1,b2,b3 stacked
            pl.BlockSpec((1, OUT_W), const2),                # b4   (1,8)
        ],
        out_specs=pl.BlockSpec((tb, OUT_W), lambda i: (i, 0)),
        compiler_params=pltpu.CompilerParams(
            dimension_semantics=("parallel",)),
        cost_estimate=pl.CostEstimate(
            flops=flops, transcendentals=0, bytes_accessed=bytes_accessed),
    )(z, packed["W1"], packed["W23"], packed["W4"], packed["B123"], packed["b4"])

    return out[:B, :1]                                                   # (B, 1)


def reference_forward(x, a, p):
    """Pure-JAX reference with the original (unfused, unpadded) weights."""
    x2 = jnp.atleast_2d(jnp.asarray(x, jnp.float32))
    a2 = jnp.atleast_2d(jnp.asarray(a, jnp.float32))
    sta = jnp.maximum(x2 @ p["ws"] + p["bs"], 0.0)
    act = jnp.maximum(a2 @ p["wa"] + p["ba"], 0.0)
    cat = jnp.concatenate([sta, act], axis=-1)
    h2 = jnp.maximum(cat @ p["w2"] + p["b2"], 0.0)
    h3 = jnp.maximum(h2 @ p["w3"] + p["b3"], 0.0)
    return h3 @ p["w4"] + p["b4"]


if __name__ == "__main__":
    key = jax.random.PRNGKey(0)
    kx, ka, kp = jax.random.split(key, 3)

    params = init_params(kp)
    packed = pack_params(params)

    # Batched inputs: each row is one (state, action) pair.
    B = 256
    x = jax.random.normal(kx, (B, 7), jnp.float32)
    a = jax.random.normal(ka, (B, 1), jnp.float32)

    q = jax.block_until_ready(qvalue_forward(x, a, packed))
    q_ref = reference_forward(x, a, params)
    assert q.shape == (B, 1)
    assert jnp.allclose(q, q_ref, atol=1e-5, rtol=1e-5)

    # Odd batch size: exercises batch padding + multi-tile grid.
    B2 = 300
    x2 = jax.random.normal(jax.random.PRNGKey(3), (B2, 7), jnp.float32)
    a2 = jax.random.normal(jax.random.PRNGKey(4), (B2, 1), jnp.float32)
    q2 = jax.block_until_ready(qvalue_forward(x2, a2, packed))
    q2_ref = reference_forward(x2, a2, params)
    assert q2.shape == (B2, 1)
    assert jnp.allclose(q2, q2_ref, atol=1e-5, rtol=1e-5)

    # Unbatched path (original PyTorch forward semantics: x (7,), a (1,)).
    x1 = jax.random.normal(jax.random.PRNGKey(1), (7,), jnp.float32)
    a1 = jax.random.normal(jax.random.PRNGKey(2), (1,), jnp.float32)
    q1 = jax.block_until_ready(qvalue_forward(x1, a1, packed))
    q1_ref = reference_forward(x1, a1, params)
    assert jnp.allclose(q1, q1_ref, atol=1e-5, rtol=1e-5)

    print("KERNEL_OK")
</pallas_src>

<mosaic_0001>
module attributes {stable_mosaic.version = 11 : i64} {
  func.func @qvalue_kernel(%arg0: i32, %arg1: memref<128x8xf32, #tpu.memory_space<vmem>>, %arg2: memref<8x128xf32, #tpu.memory_space<vmem>>, %arg3: memref<2x128x128xf32, #tpu.memory_space<vmem>>, %arg4: memref<128x8xf32, #tpu.memory_space<vmem>>, %arg5: memref<3x128xf32, #tpu.memory_space<vmem>>, %arg6: memref<1x8xf32, #tpu.memory_space<vmem>>, %arg7: memref<128x8xf32, #tpu.memory_space<vmem>>) attributes {dimension_semantics = [#tpu.dimension_semantics<parallel>], iteration_bounds = array<i64: 2>, scalar_prefetch = 0 : i64, scratch_operands = 0 : i64, tpu.core_type = #tpu.core_type<tc>, window_params = [{transform_indices = @transform_0, window_bounds = array<i64: 128, 8>}, {pipeline_mode = #tpu.pipeline_mode<synchronous>, transform_indices = @transform_1, window_bounds = array<i64: 8, 128>}, {pipeline_mode = #tpu.pipeline_mode<synchronous>, transform_indices = @transform_2, window_bounds = array<i64: 2, 128, 128>}, {pipeline_mode = #tpu.pipeline_mode<synchronous>, transform_indices = @transform_3, window_bounds = array<i64: 128, 8>}, {pipeline_mode = #tpu.pipeline_mode<synchronous>, transform_indices = @transform_4, window_bounds = array<i64: 3, 128>}, {pipeline_mode = #tpu.pipeline_mode<synchronous>, transform_indices = @transform_5, window_bounds = array<i64: 1, 8>}, {transform_indices = @transform_6, window_bounds = array<i64: 128, 8>}]} {
    %c0 = arith.constant 0 : index
    %c0_0 = arith.constant 0 : index
    %0 = vector.load %arg1[%c0, %c0_0] : memref<128x8xf32, #tpu.memory_space<vmem>>, vector<128x8xf32>
    %c0_1 = arith.constant 0 : index
    %c0_2 = arith.constant 0 : index
    %1 = vector.load %arg2[%c0_1, %c0_2] : memref<8x128xf32, #tpu.memory_space<vmem>>, vector<8x128xf32>
    %cst = arith.constant dense<0.000000e+00> : vector<128x128xf32>
    %2 = tpu.matmul %0, %1, %cst {dimension_numbers = #tpu.dot_dimension_numbers<[1], [0], [0], [1], [0, 0, 1, 1], [], []>} : vector<128x8xf32>, vector<8x128xf32>, vector<128x128xf32> -> vector<128x128xf32>
    %c0_3 = arith.constant 0 : index
    %c0_4 = arith.constant 0 : index
    %3 = vector.load %arg5[%c0_3, %c0_4] : memref<3x128xf32, #tpu.memory_space<vmem>>, vector<1x128xf32>
    %4 = vector.shape_cast %3 : vector<1x128xf32> to vector<128xf32>
    %5 = vector.shape_cast %4 : vector<128xf32> to vector<1x128xf32>
    %6 = vector.broadcast %5 : vector<1x128xf32> to vector<128x128xf32>
    %7 = arith.addf %2, %6 : vector<128x128xf32>
    %cst_5 = arith.constant 0.000000e+00 : f32
    %8 = vector.broadcast %cst_5 : f32 to vector<128x128xf32>
    %9 = arith.maximumf %7, %8 : vector<128x128xf32>
    %c0_6 = arith.constant 0 : index
    %c0_7 = arith.constant 0 : index
    %c0_8 = arith.constant 0 : index
    %10 = vector.load %arg3[%c0_6, %c0_7, %c0_8] : memref<2x128x128xf32, #tpu.memory_space<vmem>>, vector<1x128x128xf32>
    %11 = vector.shape_cast %10 : vector<1x128x128xf32> to vector<128x128xf32>
    %cst_9 = arith.constant dense<0.000000e+00> : vector<128x128xf32>
    %12 = tpu.matmul %9, %11, %cst_9 {dimension_numbers = #tpu.dot_dimension_numbers<[1], [0], [0], [1], [0, 0, 1, 1], [], []>} : vector<128x128xf32>, vector<128x128xf32>, vector<128x128xf32> -> vector<128x128xf32>
    %c1 = arith.constant 1 : index
    %c0_10 = arith.constant 0 : index
    %13 = vector.load %arg5[%c1, %c0_10] : memref<3x128xf32, #tpu.memory_space<vmem>>, vector<1x128xf32>
    %14 = vector.shape_cast %13 : vector<1x128xf32> to vector<128xf32>
    %15 = vector.shape_cast %14 : vector<128xf32> to vector<1x128xf32>
    %16 = vector.broadcast %15 : vector<1x128xf32> to vector<128x128xf32>
    %17 = arith.addf %12, %16 : vector<128x128xf32>
    %cst_11 = arith.constant 0.000000e+00 : f32
    %18 = vector.broadcast %cst_11 : f32 to vector<128x128xf32>
    %19 = arith.maximumf %17, %18 : vector<128x128xf32>
    %c1_12 = arith.constant 1 : index
    %c0_13 = arith.constant 0 : index
    %c0_14 = arith.constant 0 : index
    %20 = vector.load %arg3[%c1_12, %c0_13, %c0_14] : memref<2x128x128xf32, #tpu.memory_space<vmem>>, vector<1x128x128xf32>
    %21 = vector.shape_cast %20 : vector<1x128x128xf32> to vector<128x128xf32>
    %cst_15 = arith.constant dense<0.000000e+00> : vector<128x128xf32>
    %22 = tpu.matmul %19, %21, %cst_15 {dimension_numbers = #tpu.dot_dimension_numbers<[1], [0], [0], [1], [0, 0, 1, 1], [], []>} : vector<128x128xf32>, vector<128x128xf32>, vector<128x128xf32> -> vector<128x128xf32>
    %c2 = arith.constant 2 : index
    %c0_16 = arith.constant 0 : index
    %23 = vector.load %arg5[%c2, %c0_16] : memref<3x128xf32, #tpu.memory_space<vmem>>, vector<1x128xf32>
    %24 = vector.shape_cast %23 : vector<1x128xf32> to vector<128xf32>
    %25 = vector.shape_cast %24 : vector<128xf32> to vector<1x128xf32>
    %26 = vector.broadcast %25 : vector<1x128xf32> to vector<128x128xf32>
    %27 = arith.addf %22, %26 : vector<128x128xf32>
    %cst_17 = arith.constant 0.000000e+00 : f32
    %28 = vector.broadcast %cst_17 : f32 to vector<128x128xf32>
    %29 = arith.maximumf %27, %28 : vector<128x128xf32>
    %c0_18 = arith.constant 0 : index
    %c0_19 = arith.constant 0 : index
    %30 = vector.load %arg4[%c0_18, %c0_19] : memref<128x8xf32, #tpu.memory_space<vmem>>, vector<128x8xf32>
    %cst_20 = arith.constant dense<0.000000e+00> : vector<128x8xf32>
    %31 = tpu.matmul %29, %30, %cst_20 {dimension_numbers = #tpu.dot_dimension_numbers<[1], [0], [0], [1], [0, 0, 1, 1], [], []>} : vector<128x128xf32>, vector<128x8xf32>, vector<128x8xf32> -> vector<128x8xf32>
    %c0_21 = arith.constant 0 : index
    %c0_22 = arith.constant 0 : index
    %32 = vector.load %arg6[%c0_21, %c0_22] : memref<1x8xf32, #tpu.memory_space<vmem>>, vector<1x8xf32>
    %33 = vector.broadcast %32 : vector<1x8xf32> to vector<128x8xf32>
    %34 = arith.addf %31, %33 : vector<128x8xf32>
    %c0_23 = arith.constant 0 : index
    %c0_24 = arith.constant 0 : index
    %35 = vector.load %arg7[%c0_23, %c0_24] : memref<128x8xf32, #tpu.memory_space<vmem>>, vector<128x8xf32>
    tpu.vector_store %arg7[%c0_23, %c0_24], %34 {strides = array<i32>} : memref<128x8xf32, #tpu.memory_space<vmem>>, vector<128x8xf32>,
    return
  }
  func.func @transform_0(%arg0: i32) -> (i32, i32) {
    %c0_i32 = arith.constant 0 : i32
    %c0_i32_0 = arith.constant 0 : i32
    return %arg0, %c0_i32 : i32, i32
  }
  func.func @transform_1(%arg0: i32) -> (i32, i32) {
    %c0_i32 = arith.constant 0 : i32
    %c0_i32_0 = arith.constant 0 : i32
    %c0_i32_1 = arith.constant 0 : i32
    return %c0_i32, %c0_i32_0 : i32, i32
  }
  func.func @transform_2(%arg0: i32) -> (i32, i32, i32) {
    %c0_i32 = arith.constant 0 : i32
    %c0_i32_0 = arith.constant 0 : i32
    %c0_i32_1 = arith.constant 0 : i32
    %c0_i32_2 = arith.constant 0 : i32
    return %c0_i32, %c0_i32_0, %c0_i32_1 : i32, i32, i32
  }
  func.func @transform_3(%arg0: i32) -> (i32, i32) {
    %c0_i32 = arith.constant 0 : i32
    %c0_i32_0 = arith.constant 0 : i32
    %c0_i32_1 = arith.constant 0 : i32
    return %c0_i32, %c0_i32_0 : i32, i32
  }
  func.func @transform_4(%arg0: i32) -> (i32, i32) {
    %c0_i32 = arith.constant 0 : i32
    %c0_i32_0 = arith.constant 0 : i32
    %c0_i32_1 = arith.constant 0 : i32
    return %c0_i32, %c0_i32_0 : i32, i32
  }
  func.func @transform_5(%arg0: i32) -> (i32, i32) {
    %c0_i32 = arith.constant 0 : i32
    %c0_i32_0 = arith.constant 0 : i32
    %c0_i32_1 = arith.constant 0 : i32
    return %c0_i32, %c0_i32_0 : i32, i32
  }
  func.func @transform_6(%arg0: i32) -> (i32, i32) {
    %c0_i32 = arith.constant 0 : i32
    %c0_i32_0 = arith.constant 0 : i32
    return %arg0, %c0_i32 : i32, i32
  }
}

</mosaic_0001>

<bundles_post_ra>
// kernel: tpu_custom_call.1
= control target key start
LH: loop header
LB: loop body
LE: loop exit
PB: predicated region body
PF: predicated region fallthrough
CT: control target
= control target key end

     0   :  { %s1529_s21 = smov 0   ;;  %s1846_s0 = inlined_call_operand.vmem [shape: f32[256,8], index: 0, kind: input, shape index: {}]   ;;  %s1847_s1 = inlined_call_operand.vmem [shape: f32[8,128], index: 1, kind: input, shape index: {}]   ;;  %s1848_s2 = inlined_call_operand.vmem [shape: f32[2,128,128], index: 2, kind: input, shape index: {}]   ;;  %s1849_s3 = inlined_call_operand.vmem [shape: f32[128,8], index: 3, kind: input, shape index: {}]   ;;  %s1850_s4 = inlined_call_operand.vmem [shape: f32[3,128], index: 4, kind: input, shape index: {}]   ;;  %s1851_s5 = inlined_call_operand.vmem [shape: f32[1,8], index: 5, kind: input, shape index: {}]   ;;  %s1852_s6 = inlined_call_operand.vmem [shape: f32[256,8], index: 6, kind: output, shape index: {}]  }
   0x1 LB: > { %s1092_s22 = sadd.s32 4294967295, %s1492_s21   ;;  %p1096_p0 = scmp.ge.s32.totalorder %s1492_s21, 1  ;;  %s1492_s21 = sphi %s1529_s21, %s16_s21  }
   0x2   : > { %p213_p1 = scmp.lt.s32.totalorder %s1492_s21, 3 }
   0x4   : > { %p214_p2 = pnand %p1096_p0, %p213_p1 }
   0x5   : > { %s1097_s25 = sshll.u32 (!%p214_p2), %s1092_s22, 4 }
   0x6   : > { %217 = sbr.rel (%p214_p2) target bundleno = 842 (0x34a), region = 44  ;;  %p244_p3 = scmp.lt.s32.totalorder (!%p214_p2), %s1097_s25, 31 }
   0xb   : > { %v271_v0 = vld [vmem:[%s1847_s1] sm:$0xff]  ;;  %v502_v1 = vld [vmem:[%s1848_s2 + $0x78] sm:$0xff]  ;;  %v501_v2 = vld [vmem:[%s1848_s2 + $0x70] sm:$0xff]  ;;  %s1854_s25 = smov (!%p244_p3, %s1097_s25), 31  ;;  %vm277_vm0 = vcmask 64512  }
   0xc   : > { %1252 = vmatprep.subr.mxu0 %v271_v0  ;;  %1278 = vmatprep.subr.mxu1 %v502_v1  ;;  %v500_v3 = vld [vmem:[%s1848_s2 + $0x68] sm:$0xff]  ;;  %v499_v4 = vld [vmem:[%s1848_s2 + $0x60] sm:$0xff]  ;;  %s1098_s10 = sshll.u32 %s1854_s25, 3  ;;  %v498_v5 = vld [vmem:[%s1848_s2 + $0x58] sm:$0xff] }
   0xd   : > { %1253 = vmatpush3.msra.mxu0 %v271_v0  ;;  %1279 = vmatpush3.msra.mxu1 %v502_v1  ;;  %s1560_s13 = scalar_lea.vmem %s1846_s0, %s1098_s10  ;;  %v497_v9 = vld [vmem:[%s1848_s2 + $0x50] sm:$0xff]  ;;  %v496_v11 = vld [vmem:[%s1848_s2 + $0x48] sm:$0xff]  ;;  %v495_v13 = vld [vmem:[%s1848_s2 + $0x40] sm:$0xff]  ;;  %s1809_s30 = scalar_lea.vmem %s1852_s6, %s1098_s10 }
   0xe   : > { %1280 = vmatprep.subr.mxu1 %v501_v2  ;;  %v255_v6 = vld [vmem:[%s1560_s13] sm:$0xff]  ;;  %v256_v7 = vld [vmem:[%s1560_s13 + $0x8] sm:$0xff]  ;;  %v257_v8 = vld [vmem:[%s1560_s13 + $0x10] sm:$0xff] }
   0xf   : > { %1281 = vmatpush3.msra.mxu1 %v501_v2  ;;  %1254 = vmatprep.mubr.msk.f32.mxu0 %vm277_vm0, %v255_v6  ;;  %v258_v10 = vld [vmem:[%s1560_s13 + $0x18] sm:$0xff]  ;;  %v259_v12 = vld [vmem:[%s1560_s13 + $0x20] sm:$0xff]  ;;  %v260_v14 = vld [vmem:[%s1560_s13 + $0x28] sm:$0xff] }
  0x10   : > { %1282 = vmatprep.subr.mxu1 %v500_v3  ;;  %1255 = vmatmul.mubr.msk.f32.vlgmr.msra.gmra.mxu0 %vm277_vm0, %v256_v7  ;;  %v494_v15 = vld [vmem:[%s1848_s2 + $0x38] sm:$0xff]  ;;  %v261_v16 = vld [vmem:[%s1560_s13 + $0x30] sm:$0xff]  ;;  %v492_v19 = vld [vmem:[%s1848_s2 + $0x28] sm:$0xff] }
  0x11   : > { %1283 = vmatpush3.msra.mxu1 %v500_v3  ;;  %1257 = vmatprep.mubr.msk.f32.mxu0 %vm277_vm0, %v257_v8  ;;  %v493_v17 = vld [vmem:[%s1848_s2 + $0x30] sm:$0xff]  ;;  %v262_v18 = vld [vmem:[%s1560_s13 + $0x38] sm:$0xff]  ;;  %v263_v20 = vld [vmem:[%s1560_s13 + $0x40] sm:$0xff] }
  0x12   : > { %1284 = vmatprep.subr.mxu1 %v499_v4  ;;  %v491_v21 = vld [vmem:[%s1848_s2 + $0x20] sm:$0xff]  ;;  %v264_v22 = vld [vmem:[%s1560_s13 + $0x48] sm:$0xff]  ;;  %v265_v23 = vld [vmem:[%s1560_s13 + $0x50] sm:$0xff] }
  0x13   : > { %1285 = vmatpush3.msra.mxu1 %v499_v4  ;;  %v266_v24 = vld [vmem:[%s1560_s13 + $0x58] sm:$0xff]  ;;  %v267_v25 = vld [vmem:[%s1560_s13 + $0x60] sm:$0xff]  ;;  %v268_v26 = vld [vmem:[%s1560_s13 + $0x68] sm:$0xff] }
  0x14   : > { %1286 = vmatprep.subr.mxu1 %v498_v5  ;;  %1258 = vmatmul.mubr.msk.f32.gmra.mxu0 %vm277_vm0, %v258_v10  ;;  %v269_v27 = vld [vmem:[%s1560_s13 + $0x70] sm:$0xff]  ;;  %v270_v28 = vld [vmem:[%s1560_s13 + $0x78] sm:$0xff]  ;;  %v488_v31 = vld [vmem:[%s1848_s2 + $0x8] sm:$0xff] }
  0x15   : > { %1287 = vmatpush3.msra.mxu1 %v498_v5  ;;  %1260 = vmatprep.mubr.msk.f32.mxu0 %vm277_vm0, %v259_v12  ;;  %v490_v29 = vld [vmem:[%s1848_s2 + $0x18] sm:$0xff]  ;;  %v489_v30 = vld [vmem:[%s1848_s2 + $0x10] sm:$0xff]  ;;  %v487_v32 = vld [vmem:[%s1848_s2] sm:$0xff] }
  0x16   : > { %1288 = vmatprep.subr.mxu1 %v497_v9  ;;  %v1134_v33 = vld [vmem:[%s1848_s2 + $0xf8] sm:$0xff]  ;;  %v1133_v34 = vld [vmem:[%s1848_s2 + $0xf0] sm:$0xff]  ;;  %v1132_v35 = vld [vmem:[%s1848_s2 + $0xe8] sm:$0xff] }
  0x17   : > { %1289 = vmatpush3.msra.mxu1 %v497_v9  ;;  %1334 = vmatprep.subr.mxu0 %v1134_v33  ;;  %v1131_v36 = vld [vmem:[%s1848_s2 + $0xe0] sm:$0xff]  ;;  %v1130_v37 = vld [vmem:[%s1848_s2 + $0xd8] sm:$0xff]  ;;  %v1129_v38 = vld [vmem:[%s1848_s2 + $0xd0] sm:$0xff] }
  0x18   : > { %1290 = vmatprep.subr.mxu1 %v496_v11  ;;  %1261 = vmatmul.mubr.msk.f32.gmra.mxu0 %vm277_vm0, %v260_v14  ;;  %v1128_v39 = vld [vmem:[%s1848_s2 + $0xc8] sm:$0xff]  ;;  %v1127_v40 = vld [vmem:[%s1848_s2 + $0xc0] sm:$0xff]  ;;  %v1126_v41 = vld [vmem:[%s1848_s2 + $0xb8] sm:$0xff] }
  0x19   : > { %1291 = vmatpush3.msra.mxu1 %v496_v11  ;;  %1263 = vmatprep.mubr.msk.f32.mxu0 %vm277_vm0, %v261_v16  ;;  %v1125_v42 = vld [vmem:[%s1848_s2 + $0xb0] sm:$0xff]  ;;  %v1124_v43 = vld [vmem:[%s1848_s2 + $0xa8] sm:$0xff]  ;;  %v1123_v44 = vld [vmem:[%s1848_s2 + $0xa0] sm:$0xff] }
  0x1a   : > { %1292 = vmatprep.subr.mxu1 %v495_v13  ;;  %1335 = vmatpush3.msra.mxu0 %v1134_v33  ;;  %v1122_v45 = vld [vmem:[%s1848_s2 + $0x98] sm:$0xff]  ;;  %v1101_v46 = vld [vmem:[%s1850_s4] ss:$0 sm:$0xff] }
  0x1b   : > { %1293 = vmatpush3.msra.mxu1 %v495_v13  ;;  %1336 = vmatprep.subr.mxu0 %v1133_v34  ;;  %v1119_v33 = vld [vmem:[%s1848_s2 + $0x80] sm:$0xff] }
  0x1c   : > { %1294 = vmatprep.subr.mxu1 %v494_v15  ;;  %1264 = vmatmul.mubr.msk.f32.gmra.mxu0 %vm277_vm0, %v262_v18 }
  0x1d   : > { %1295 = vmatpush3.msra.mxu1 %v494_v15  ;;  %1266 = vmatprep.mubr.msk.f32.mxu0 %vm277_vm0, %v263_v20 }
  0x1e   : > { %1296 = vmatprep.subr.mxu1 %v493_v17  ;;  %1337 = vmatpush3.msra.mxu0 %v1133_v34  ;;  %v867_v34 = vld [vmem:[%s1849_s3 + $0x78] sm:$0xff] }
  0x1f   : > { %1297 = vmatpush3.msra.mxu1 %v493_v17  ;;  %1338 = vmatprep.subr.mxu0 %v1132_v35 }
  0x20   : > { %1298 = vmatprep.subr.mxu1 %v492_v19  ;;  %1267 = vmatmul.mubr.msk.f32.gmra.mxu0 %vm277_vm0, %v264_v22 }
  0x21   : > { %1299 = vmatpush3.msra.mxu1 %v492_v19  ;;  %1269 = vmatprep.mubr.msk.f32.mxu0 %vm277_vm0, %v265_v23 }
  0x22   : > { %1300 = vmatprep.subr.mxu1 %v491_v21  ;;  %1339 = vmatpush3.msra.mxu0 %v1132_v35  ;;  %v866_v35 = vld [vmem:[%s1849_s3 + $0x70] sm:$0xff] }
  0x23   : > { %1301 = vmatpush3.msra.mxu1 %v491_v21  ;;  %1340 = vmatprep.subr.mxu0 %v1131_v36 }
  0x24   : > { %1270 = vmatmul.mubr.msk.f32.gmra.mxu0 %vm277_vm0, %v266_v24  ;;  %1302 = vmatprep.subr.mxu1 %v490_v29 }
  0x25   : > { %1272 = vmatprep.mubr.msk.f32.mxu0 %vm277_vm0, %v267_v25  ;;  %1303 = vmatpush3.msra.mxu1 %v490_v29 }
  0x26   : > { %1304 = vmatprep.subr.mxu1 %v489_v30  ;;  %1341 = vmatpush3.msra.mxu0 %v1131_v36  ;;  %v865_v36 = vld [vmem:[%s1849_s3 + $0x68] sm:$0xff] }
  0x27   : > { %1305 = vmatpush3.msra.mxu1 %v489_v30  ;;  %1342 = vmatprep.subr.mxu0 %v1130_v37 }
  0x28   : > { %1273 = vmatmul.mubr.msk.f32.gmra.mxu0 %vm277_vm0, %v268_v26  ;;  %1306 = vmatprep.subr.mxu1 %v488_v31 }
  0x29   : > { %1275 = vmatprep.mubr.msk.f32.mxu0 %vm277_vm0, %v269_v27  ;;  %1307 = vmatpush3.msra.mxu1 %v488_v31  ;;  %v1121_v31 = vld [vmem:[%s1848_s2 + $0x90] sm:$0xff] }
  0x2a   : > { %1308 = vmatprep.subr.mxu1 %v487_v32  ;;  %1343 = vmatpush3.msra.mxu0 %v1130_v37  ;;  %v864_v37 = vld [vmem:[%s1849_s3 + $0x60] sm:$0xff] }
  0x2b   : > { %1309 = vmatpush3.msra.mxu1 %v487_v32  ;;  %1344 = vmatprep.subr.mxu0 %v1129_v38  ;;  %v1120_v32 = vld [vmem:[%s1848_s2 + $0x88] sm:$0xff] }
  0x2c   : > { %1276 = vmatmul.mubr.msk.f32.gmra.mxu0 %vm277_vm0, %v270_v28  ;;  %1446 = vmatprep.subr.mxu1 %v867_v34 }
  0x2d   : > { %1345 = vmatpush3.msra.mxu0 %v1129_v38  ;;  %v1696_v38 = vld [vmem:[%s1849_s3 + $0x58] sm:$0xff] }
  0x2e   : > { %1346 = vmatprep.subr.mxu0 %v1128_v39 }
  0x2f   : > { %1347 = vmatpush3.msra.mxu0 %v1128_v39  ;;  %v1702_v39 = vld [vmem:[%s1849_s3 + $0x50] sm:$0xff] }
  0x30   : > { %1348 = vmatprep.subr.mxu0 %v1127_v40 }
  0x31   : > { %1349 = vmatpush3.msra.mxu0 %v1127_v40  ;;  %v1709_v40 = vld [vmem:[%s1849_s3 + $0x48] sm:$0xff] }
  0x32   : > { %1350 = vmatprep.subr.mxu0 %v1126_v41 }
  0x33   : > { %1351 = vmatpush3.msra.mxu0 %v1126_v41  ;;  %v1716_v41 = vld [vmem:[%s1849_s3 + $0x40] sm:$0xff] }
  0x34   : > { %1352 = vmatprep.subr.mxu0 %v1125_v42 }
  0x35   : > { %1353 = vmatpush3.msra.mxu0 %v1125_v42  ;;  %v1723_v42 = vld [vmem:[%s1849_s3 + $0x38] sm:$0xff] }
  0x36   : > { %1354 = vmatprep.subr.mxu0 %v1124_v43 }
  0x37   : > { %1355 = vmatpush3.msra.mxu0 %v1124_v43  ;;  %v1730_v43 = vld [vmem:[%s1849_s3 + $0x30] sm:$0xff] }
  0x38   : > { %1356 = vmatprep.subr.mxu0 %v1123_v44 }
  0x39   : > { %1357 = vmatpush3.msra.mxu0 %v1123_v44  ;;  %v1737_v44 = vld [vmem:[%s1849_s3 + $0x28] sm:$0xff] }
  0x3a   : > { %1358 = vmatprep.subr.mxu0 %v1122_v45 }
  0x3b   : > { %1359 = vmatpush3.msra.mxu0 %v1122_v45  ;;  %v1744_v45 = vld [vmem:[%s1849_s3 + $0x20] sm:$0xff] }
  0x3c   : > { %1360 = vmatprep.subr.mxu0 %v1121_v31 }
  0x3d   : > { %1361 = vmatpush3.msra.mxu0 %v1121_v31  ;;  %v855_v31 = vld [vmem:[%s1849_s3 + $0x18] sm:$0xff] }
  0x3e   : > { %1362 = vmatprep.subr.mxu0 %v1120_v32 }
  0x3f   : > { %1363 = vmatpush3.msra.mxu0 %v1120_v32  ;;  %v854_v32 = vld [vmem:[%s1849_s3 + $0x10] sm:$0xff] }
  0x40   : > { %1364 = vmatprep.subr.mxu0 %v1119_v33 }
  0x41   : > { %1365 = vmatpush3.msra.mxu0 %v1119_v33  ;;  %v853_v33 = vld [vmem:[%s1849_s3 + $0x8] sm:$0xff] }
  0x42   : > { %1390 = vmatprep.subr.mxu0 %v867_v34 }
  0xd0   : > { %v1256_v47 = vpop.f32.mrf.mxu0 }
  0xd1   : > { %v398_v48 = vadd.f32 %v1256_v47, %v1101_v46 }
  0xd2   : > { %v392_v49 = vpop.f32.mrf.mxu0 }
  0xd3   : > { %v393_v50 = vadd.f32 %v1101_v46, %v392_v49  ;;  %v472_v53 = vmax.f32 %v398_v48, 0.0 }
  0xd4   : > { %v1259_v51 = vpop.f32.mrf.mxu0 }
  0xd5   : > { %v471_v52 = vmax.f32 %v393_v50, 0.0  ;;  %v408_v54 = vadd.f32 %v1259_v51, %v1101_v46 }
  0xd6   : > { %v402_v55 = vpop.f32.mrf.mxu0 }
  0xd7   : > { %v403_v56 = vadd.f32 %v1101_v46, %v402_v55  ;;  %1310 = vmatprep.mubr.f32.mxu1 %v471_v52  ;;  %v474_v59 = vmax.f32 %v408_v54, 0.0 }
  0xd8   : > { %v1262_v57 = vpop.f32.mrf.mxu0  ;;  %1311 = vmatmul.mubr.f32.vlgmr.msra.gmra.mxu1 %v472_v53 }
  0xd9   : > { %v473_v58 = vmax.f32 %v403_v56, 0.0  ;;  %v418_v60 = vadd.f32 %v1262_v57, %v1101_v46  ;;  %1462 = vmatpush3.msra.mxu1 %v867_v34 }
  0xda   : > { %v412_v61 = vpop.f32.mrf.mxu0  ;;  %1447 = vmatprep.subr.mxu1 %v866_v35 }
  0xdb   : > { %v413_v62 = vadd.f32 %v1101_v46, %v412_v61  ;;  %1313 = vmatprep.mubr.f32.mxu1 %v473_v58  ;;  %v476_v1 = vmax.f32 %v418_v60, 0.0  ;;  %1463 = vmatpush3.msra.mxu1 %v866_v35 }
  0xdc   : > { %v1265_v63 = vpop.f32.mrf.mxu0  ;;  %1314 = vmatmul.mubr.f32.gmra.mxu1 %v474_v59  ;;  %1448 = vmatprep.subr.mxu1 %v865_v36 }
  0xdd   : > { %v475_v0 = vmax.f32 %v413_v62, 0.0  ;;  %v428_v2 = vadd.f32 %v1265_v63, %v1101_v46  ;;  %1464 = vmatpush3.msra.mxu1 %v865_v36 }
  0xde   : > { %v422_v3 = vpop.f32.mrf.mxu0  ;;  %1449 = vmatprep.subr.mxu1 %v864_v37 }
  0xdf   : > { %v423_v4 = vadd.f32 %v1101_v46, %v422_v3  ;;  %1316 = vmatprep.mubr.f32.mxu1 %v475_v0  ;;  %v478_v7 = vmax.f32 %v428_v2, 0.0  ;;  %1465 = vmatpush3.msra.mxu1 %v864_v37 }
  0xe0   : > { %v1268_v5 = vpop.f32.mrf.mxu0  ;;  %1317 = vmatmul.mubr.f32.gmra.mxu1 %v476_v1  ;;  %1450 = vmatprep.subr.mxu1 %v1696_v38 }
  0xe1   : > { %v477_v6 = vmax.f32 %v423_v4, 0.0  ;;  %v438_v8 = vadd.f32 %v1268_v5, %v1101_v46  ;;  %1466 = vmatpush3.msra.mxu1 %v1696_v38 }
  0xe2   : > { %v432_v9 = vpop.f32.mrf.mxu0  ;;  %1451 = vmatprep.subr.mxu1 %v1702_v39 }
  0xe3   : > { %v433_v10 = vadd.f32 %v1101_v46, %v432_v9  ;;  %1319 = vmatprep.mubr.f32.mxu1 %v477_v6  ;;  %v480_v13 = vmax.f32 %v438_v8, 0.0  ;;  %1467 = vmatpush3.msra.mxu1 %v1702_v39 }
  0xe4   : > { %v1271_v11 = vpop.f32.mrf.mxu0  ;;  %1320 = vmatmul.mubr.f32.gmra.mxu1 %v478_v7  ;;  %1452 = vmatprep.subr.mxu1 %v1709_v40 }
  0xe5   : > { %v479_v12 = vmax.f32 %v433_v10, 0.0  ;;  %v448_v14 = vadd.f32 %v1271_v11, %v1101_v46  ;;  %1468 = vmatpush3.msra.mxu1 %v1709_v40 }
  0xe6   : > { %v442_v15 = vpop.f32.mrf.mxu0  ;;  %1453 = vmatprep.subr.mxu1 %v1716_v41 }
  0xe7   : > { %v443_v16 = vadd.f32 %v1101_v46, %v442_v15  ;;  %1322 = vmatprep.mubr.f32.mxu1 %v479_v12  ;;  %v482_v19 = vmax.f32 %v448_v14, 0.0  ;;  %1469 = vmatpush3.msra.mxu1 %v1716_v41 }
  0xe8   : > { %v1274_v17 = vpop.f32.mrf.mxu0  ;;  %1323 = vmatmul.mubr.f32.gmra.mxu1 %v480_v13  ;;  %1454 = vmatprep.subr.mxu1 %v1723_v42 }
  0xe9   : > { %v481_v18 = vmax.f32 %v443_v16, 0.0  ;;  %v458_v20 = vadd.f32 %v1274_v17, %v1101_v46  ;;  %1470 = vmatpush3.msra.mxu1 %v1723_v42 }
  0xea   : > { %v452_v21 = vpop.f32.mrf.mxu0  ;;  %1455 = vmatprep.subr.mxu1 %v1730_v43 }
  0xeb   : > { %v453_v22 = vadd.f32 %v1101_v46, %v452_v21  ;;  %1325 = vmatprep.mubr.f32.mxu1 %v481_v18  ;;  %v484_v25 = vmax.f32 %v458_v20, 0.0  ;;  %1471 = vmatpush3.msra.mxu1 %v1730_v43 }
  0xec   : > { %v1277_v23 = vpop.f32.mrf.mxu0  ;;  %1326 = vmatmul.mubr.f32.gmra.mxu1 %v482_v19  ;;  %1456 = vmatprep.subr.mxu1 %v1737_v44 }
  0xed   : > { %v483_v24 = vmax.f32 %v453_v22, 0.0  ;;  %v468_v26 = vadd.f32 %v1277_v23, %v1101_v46  ;;  %1472 = vmatpush3.msra.mxu1 %v1737_v44 }
  0xee   : > { %v462_v27 = vpop.f32.mrf.mxu0  ;;  %1457 = vmatprep.subr.mxu1 %v1744_v45 }
  0xef   : > { %v463_v28 = vadd.f32 %v1101_v46, %v462_v27  ;;  %1328 = vmatprep.mubr.f32.mxu1 %v483_v24  ;;  %v486_v30 = vmax.f32 %v468_v26, 0.0  ;;  %1473 = vmatpush3.msra.mxu1 %v1744_v45  ;;  %v1752_v46 = vld [vmem:[%s1850_s4 + $0x1] ss:$0 sm:$0xff] }
  0xf0   : > { %1329 = vmatmul.mubr.f32.gmra.mxu1 %v484_v25  ;;  %1458 = vmatprep.subr.mxu1 %v855_v31 }
  0xf1   : > { %v485_v29 = vmax.f32 %v463_v28, 0.0  ;;  %1474 = vmatpush3.msra.mxu1 %v855_v31 }
  0xf2   : > { %1459 = vmatprep.subr.mxu1 %v854_v32 }
  0xf3   : > { %1331 = vmatprep.mubr.f32.mxu1 %v485_v29  ;;  %1475 = vmatpush3.msra.mxu1 %v854_v32 }
  0xf4   : > { %1332 = vmatmul.mubr.f32.gmra.mxu1 %v486_v30  ;;  %1460 = vmatprep.subr.mxu1 %v853_v33 }
  0xf5   : > { %1476 = vmatpush3.msra.mxu1 %v853_v33 }
 0x198   : > { %v1312_v47 = vpop.f32.mrf.mxu1 }
 0x199   : > { %v580_v48 = vadd.f32 %v1312_v47, %v1752_v46 }
 0x19a   : > { %v574_v49 = vpop.f32.mrf.mxu1 }
 0x19b   : > { %v575_v50 = vadd.f32 %v1752_v46, %v574_v49  ;;  %v654_v53 = vmax.f32 %v580_v48, 0.0 }
 0x19c   : > { %v1315_v51 = vpop.f32.mrf.mxu1 }
 0x19d   : > { %v653_v52 = vmax.f32 %v575_v50, 0.0  ;;  %v590_v54 = vadd.f32 %v1315_v51, %v1752_v46 }
 0x19e   : > { %v584_v55 = vpop.f32.mrf.mxu1 }
 0x19f   : > { %v585_v56 = vadd.f32 %v1752_v46, %v584_v55  ;;  %1366 = vmatprep.mubr.f32.mxu0 %v653_v52  ;;  %v656_v59 = vmax.f32 %v590_v54, 0.0 }
 0x1a0   : > { %v1318_v57 = vpop.f32.mrf.mxu1  ;;  %1367 = vmatmul.mubr.f32.vlgmr.msra.gmra.mxu0 %v654_v53 }
 0x1a1   : > { %v655_v58 = vmax.f32 %v585_v56, 0.0  ;;  %1391 = vmatpush3.msra.mxu0 %v867_v34  ;;  %v600_v60 = vadd.f32 %v1318_v57, %v1752_v46  ;;  %v852_v34 = vld [vmem:[%s1849_s3] sm:$0xff] }
 0x1a2   : > { %v594_v61 = vpop.f32.mrf.mxu1  ;;  %1392 = vmatprep.subr.mxu0 %v866_v35  ;;  %1461 = vmatprep.subr.mxu1 %v852_v34 }
 0x1a3   : > { %v595_v62 = vadd.f32 %v1752_v46, %v594_v61  ;;  %1369 = vmatprep.mubr.f32.mxu0 %v655_v58  ;;  %1393 = vmatpush3.msra.mxu0 %v866_v35  ;;  %v658_v1 = vmax.f32 %v600_v60, 0.0  ;;  %v1135_v35 = vld [vmem:[%s1850_s4 + $0x2] ss:$0 sm:$0xff] }
 0x1a4   : > { %v1321_v63 = vpop.f32.mrf.mxu1  ;;  %1370 = vmatmul.mubr.f32.gmra.mxu0 %v656_v59  ;;  %1394 = vmatprep.subr.mxu0 %v865_v36 }
 0x1a5   : > { %v657_v0 = vmax.f32 %v595_v62, 0.0  ;;  %1395 = vmatpush3.msra.mxu0 %v865_v36  ;;  %v610_v2 = vadd.f32 %v1321_v63, %v1752_v46  ;;  %1477 = vmatpush3.msra.mxu1 %v852_v34 }
 0x1a6   : > { %v604_v3 = vpop.f32.mrf.mxu1  ;;  %1396 = vmatprep.subr.mxu0 %v864_v37 }
 0x1a7   : > { %v605_v4 = vadd.f32 %v1752_v46, %v604_v3  ;;  %1372 = vmatprep.mubr.f32.mxu0 %v657_v0  ;;  %1397 = vmatpush3.msra.mxu0 %v864_v37  ;;  %v660_v7 = vmax.f32 %v610_v2, 0.0 }
 0x1a8   : > { %v1324_v5 = vpop.f32.mrf.mxu1  ;;  %1373 = vmatmul.mubr.f32.gmra.mxu0 %v658_v1  ;;  %1398 = vmatprep.subr.mxu0 %v1696_v38 }
 0x1a9   : > { %v659_v6 = vmax.f32 %v605_v4, 0.0  ;;  %1399 = vmatpush3.msra.mxu0 %v1696_v38  ;;  %v620_v8 = vadd.f32 %v1324_v5, %v1752_v46 }
 0x1aa   : > { %v614_v9 = vpop.f32.mrf.mxu1  ;;  %1400 = vmatprep.subr.mxu0 %v1702_v39 }
 0x1ab   : > { %v615_v10 = vadd.f32 %v1752_v46, %v614_v9  ;;  %1375 = vmatprep.mubr.f32.mxu0 %v659_v6  ;;  %1401 = vmatpush3.msra.mxu0 %v1702_v39  ;;  %v662_v13 = vmax.f32 %v620_v8, 0.0 }
 0x1ac   : > { %v1327_v11 = vpop.f32.mrf.mxu1  ;;  %1376 = vmatmul.mubr.f32.gmra.mxu0 %v660_v7  ;;  %1402 = vmatprep.subr.mxu0 %v1709_v40 }
 0x1ad   : > { %v661_v12 = vmax.f32 %v615_v10, 0.0  ;;  %1403 = vmatpush3.msra.mxu0 %v1709_v40  ;;  %v630_v14 = vadd.f32 %v1327_v11, %v1752_v46 }
 0x1ae   : > { %v624_v15 = vpop.f32.mrf.mxu1  ;;  %1404 = vmatprep.subr.mxu0 %v1716_v41 }
 0x1af   : > { %v625_v16 = vadd.f32 %v1752_v46, %v624_v15  ;;  %1378 = vmatprep.mubr.f32.mxu0 %v661_v12  ;;  %1405 = vmatpush3.msra.mxu0 %v1716_v41  ;;  %v664_v19 = vmax.f32 %v630_v14, 0.0 }
 0x1b0   : > { %v1330_v17 = vpop.f32.mrf.mxu1  ;;  %1379 = vmatmul.mubr.f32.gmra.mxu0 %v662_v13  ;;  %1406 = vmatprep.subr.mxu0 %v1723_v42 }
 0x1b1   : > { %v663_v18 = vmax.f32 %v625_v16, 0.0  ;;  %1407 = vmatpush3.msra.mxu0 %v1723_v42  ;;  %v640_v20 = vadd.f32 %v1330_v17, %v1752_v46 }
 0x1b2   : > { %v634_v21 = vpop.f32.mrf.mxu1  ;;  %1408 = vmatprep.subr.mxu0 %v1730_v43 }
 0x1b3   : > { %v635_v22 = vadd.f32 %v1752_v46, %v634_v21  ;;  %1381 = vmatprep.mubr.f32.mxu0 %v663_v18  ;;  %1409 = vmatpush3.msra.mxu0 %v1730_v43  ;;  %v666_v25 = vmax.f32 %v640_v20, 0.0  ;;  %v1136_v20 = vld [vmem:[%s1851_s5] ss:$0 sm:$0xff] }
 0x1b4   : > { %v1333_v23 = vpop.f32.mrf.mxu1  ;;  %1382 = vmatmul.mubr.f32.gmra.mxu0 %v664_v19  ;;  %1410 = vmatprep.subr.mxu0 %v1737_v44 }
 0x1b5   : > { %v665_v24 = vmax.f32 %v635_v22, 0.0  ;;  %1411 = vmatpush3.msra.mxu0 %v1737_v44  ;;  %v650_v26 = vadd.f32 %v1333_v23, %v1752_v46 }
 0x1b6   : > { %v644_v27 = vpop.f32.mrf.mxu1  ;;  %1412 = vmatprep.subr.mxu0 %v1744_v45 }
 0x1b7   : > { %v645_v28 = vadd.f32 %v1752_v46, %v644_v27  ;;  %1384 = vmatprep.mubr.f32.mxu0 %v665_v24  ;;  %1413 = vmatpush3.msra.mxu0 %v1744_v45  ;;  %v668_v30 = vmax.f32 %v650_v26, 0.0 }
 0x1b8   : > { %1385 = vmatmul.mubr.f32.gmra.mxu0 %v666_v25  ;;  %1414 = vmatprep.subr.mxu0 %v855_v31 }
 0x1b9   : > { %v667_v29 = vmax.f32 %v645_v28, 0.0  ;;  %1415 = vmatpush3.msra.mxu0 %v855_v31 }
 0x1ba   : > { %1416 = vmatprep.subr.mxu0 %v854_v32 }
 0x1bb   : > { %1387 = vmatprep.mubr.f32.mxu0 %v667_v29  ;;  %1417 = vmatpush3.msra.mxu0 %v854_v32 }
 0x1bc   : > { %1388 = vmatmul.mubr.f32.gmra.mxu0 %v668_v30  ;;  %1418 = vmatprep.subr.mxu0 %v853_v33 }
 0x1bd   : > { %1419 = vmatpush3.msra.mxu0 %v853_v33 }
 0x1be   : > { %1420 = vmatprep.subr.mxu0 %v852_v34 }
 0x1bf   : > { %1421 = vmatpush3.msra.mxu0 %v852_v34 }
 0x260   : > { %v1368_v36 = vpop.f32.mrf.mxu0 }
 0x261   : > { %v763_v37 = vadd.f32 %v1368_v36, %v1135_v35 }
 0x262   : > { %v757_v38 = vpop.f32.mrf.mxu0 }
 0x263   : > { %v758_v39 = vadd.f32 %v1135_v35, %v757_v38  ;;  %v837_v42 = vmax.f32 %v763_v37, 0.0 }
 0x264   : > { %v1371_v40 = vpop.f32.mrf.mxu0 }
 0x265   : > { %v836_v41 = vmax.f32 %v758_v39, 0.0  ;;  %v773_v43 = vadd.f32 %v1371_v40, %v1135_v35 }
 0x266   : > { %v767_v44 = vpop.f32.mrf.mxu0 }
 0x267   : > { %v768_v45 = vadd.f32 %v1135_v35, %v767_v44  ;;  %1422 = vmatprep.mubr.f32.mxu0 %v836_v41  ;;  %v839_v48 = vmax.f32 %v773_v43, 0.0 }
 0x268   : > { %v1374_v46 = vpop.f32.mrf.mxu0  ;;  %1423 = vmatmul.mubr.f32.vlgmr.msra.gmra.mxu0 %v837_v42 }
 0x269   : > { %v838_v47 = vmax.f32 %v768_v45, 0.0  ;;  %v783_v49 = vadd.f32 %v1374_v46, %v1135_v35 }
 0x26a   : > { %v777_v50 = vpop.f32.mrf.mxu0 }
 0x26b   : > { %v778_v51 = vadd.f32 %v1135_v35, %v777_v50  ;;  %1425 = vmatprep.mubr.f32.mxu0 %v838_v47  ;;  %v841_v54 = vmax.f32 %v783_v49, 0.0 }
 0x26c   : > { %v1377_v52 = vpop.f32.mrf.mxu0  ;;  %1426 = vmatmul.mubr.f32.gmra.mxu0 %v839_v48 }
 0x26d   : > { %v840_v53 = vmax.f32 %v778_v51, 0.0  ;;  %v793_v55 = vadd.f32 %v1377_v52, %v1135_v35 }
 0x26e   : > { %v787_v56 = vpop.f32.mrf.mxu0 }
 0x26f   : > { %v788_v57 = vadd.f32 %v1135_v35, %v787_v56  ;;  %1428 = vmatprep.mubr.f32.mxu0 %v840_v53  ;;  %v843_v60 = vmax.f32 %v793_v55, 0.0 }
 0x270   : > { %v1380_v58 = vpop.f32.mrf.mxu0  ;;  %1429 = vmatmul.mubr.f32.gmra.mxu0 %v841_v54 }
 0x271   : > { %v842_v59 = vmax.f32 %v788_v57, 0.0  ;;  %v803_v61 = vadd.f32 %v1380_v58, %v1135_v35 }
 0x272   : > { %v797_v62 = vpop.f32.mrf.mxu0 }
 0x273   : > { %v798_v63 = vadd.f32 %v1135_v35, %v797_v62  ;;  %1431 = vmatprep.mubr.f32.mxu1 %v842_v59  ;;  %v845_v2 = vmax.f32 %v803_v61, 0.0 }
 0x274   : > { %v1383_v0 = vpop.f32.mrf.mxu0  ;;  %1432 = vmatmul.mubr.f32.vlgmr.msra.gmra.mxu1 %v843_v60 }
 0x275   : > { %v844_v1 = vmax.f32 %v798_v63, 0.0  ;;  %v813_v3 = vadd.f32 %v1383_v0, %v1135_v35 }
 0x276   : > { %v807_v4 = vpop.f32.mrf.mxu0 }
 0x277   : > { %v808_v5 = vadd.f32 %v1135_v35, %v807_v4  ;;  %1434 = vmatprep.mubr.f32.mxu1 %v844_v1  ;;  %v847_v8 = vmax.f32 %v813_v3, 0.0 }
 0x278   : > { %v1386_v6 = vpop.f32.mrf.mxu0  ;;  %1435 = vmatmul.mubr.f32.gmra.mxu1 %v845_v2 }
 0x279   : > { %v846_v7 = vmax.f32 %v808_v5, 0.0  ;;  %v823_v9 = vadd.f32 %v1386_v6, %v1135_v35 }
 0x27a   : > { %v817_v10 = vpop.f32.mrf.mxu0 }
 0x27b   : > { %v818_v11 = vadd.f32 %v1135_v35, %v817_v10  ;;  %1437 = vmatprep.mubr.f32.mxu1 %v846_v7  ;;  %v849_v14 = vmax.f32 %v823_v9, 0.0 }
 0x27c   : > { %v1389_v12 = vpop.f32.mrf.mxu0  ;;  %1438 = vmatmul.mubr.f32.gmra.mxu1 %v847_v8 }
 0x27d   : > { %v848_v13 = vmax.f32 %v818_v11, 0.0  ;;  %v833_v15 = vadd.f32 %v1389_v12, %v1135_v35 }
 0x27e   : > { %v827_v16 = vpop.f32.mrf.mxu0 }
 0x27f   : > { %v828_v17 = vadd.f32 %v1135_v35, %v827_v16  ;;  %1440 = vmatprep.mubr.f32.mxu1 %v848_v13  ;;  %v851_v19 = vmax.f32 %v833_v15, 0.0 }
 0x280   : > { %1441 = vmatmul.mubr.f32.gmra.mxu1 %v849_v14 }
 0x281   : > { %v850_v18 = vmax.f32 %v828_v17, 0.0 }
 0x283   : > { %1443 = vmatprep.mubr.f32.mxu1 %v850_v18 }
 0x284   : > { %1444 = vmatmul.mubr.f32.gmra.mxu1 %v851_v19 }
 0x328   : > { %v1424_v21 = vpop.f32.mrf.mxu0 }
 0x329   : > { %v947_v22 = vadd.f32 %v1424_v21, %v1136_v20 }
 0x32a   : > { %v941_v23 = vpop.f32.mrf.mxu0 }
 0x32b   : > { %1021 = vst.msk [vmem:[%s1809_s30 + $0x8] sm:$0xff] %vm277_vm0, %v947_v22  ;;  %v942_v24 = vadd.f32 %v1136_v20, %v941_v23 }
 0x32c   : > { %v1427_v25 = vpop.f32.mrf.mxu0 }
 0x32d   : > { %1020 = vst.msk [vmem:[%s1809_s30] sm:$0xff] %vm277_vm0, %v942_v24  ;;  %v957_v26 = vadd.f32 %v1427_v25, %v1136_v20 }
 0x32e   : > { %v951_v27 = vpop.f32.mrf.mxu0 }
 0x32f   : > { %1023 = vst.msk [vmem:[%s1809_s30 + $0x18] sm:$0xff] %vm277_vm0, %v957_v26  ;;  %v952_v28 = vadd.f32 %v1136_v20, %v951_v27 }
 0x330   : > { %v1430_v29 = vpop.f32.mrf.mxu0 }
 0x331   : > { %1022 = vst.msk [vmem:[%s1809_s30 + $0x10] sm:$0xff] %vm277_vm0, %v952_v28  ;;  %v967_v30 = vadd.f32 %v1430_v29, %v1136_v20 }
 0x332   : > { %v961_v31 = vpop.f32.mrf.mxu0 }
 0x333   : > { %1025 = vst.msk [vmem:[%s1809_s30 + $0x28] sm:$0xff] %vm277_vm0, %v967_v30  ;;  %v962_v32 = vadd.f32 %v1136_v20, %v961_v31 }
 0x334   : > { %v1433_v33 = vpop.f32.mrf.mxu1 }
 0x335   : > { %1024 = vst.msk [vmem:[%s1809_s30 + $0x20] sm:$0xff] %vm277_vm0, %v962_v32  ;;  %v977_v34 = vadd.f32 %v1433_v33, %v1136_v20 }
 0x336   : > { %v971_v35 = vpop.f32.mrf.mxu1 }
 0x337   : > { %1027 = vst.msk [vmem:[%s1809_s30 + $0x38] sm:$0xff] %vm277_vm0, %v977_v34  ;;  %v972_v36 = vadd.f32 %v1136_v20, %v971_v35 }
 0x338   : > { %v1436_v37 = vpop.f32.mrf.mxu1 }
 0x339   : > { %1026 = vst.msk [vmem:[%s1809_s30 + $0x30] sm:$0xff] %vm277_vm0, %v972_v36  ;;  %v987_v38 = vadd.f32 %v1436_v37, %v1136_v20 }
 0x33a   : > { %v981_v39 = vpop.f32.mrf.mxu1 }
 0x33b   : > { %1029 = vst.msk [vmem:[%s1809_s30 + $0x48] sm:$0xff] %vm277_vm0, %v987_v38  ;;  %v982_v40 = vadd.f32 %v1136_v20, %v981_v39 }
 0x33c   : > { %v1439_v41 = vpop.f32.mrf.mxu1 }
 0x33d   : > { %1028 = vst.msk [vmem:[%s1809_s30 + $0x40] sm:$0xff] %vm277_vm0, %v982_v40  ;;  %v997_v42 = vadd.f32 %v1439_v41, %v1136_v20 }
 0x33e   : > { %v991_v43 = vpop.f32.mrf.mxu1 }
 0x33f   : > { %1031 = vst.msk [vmem:[%s1809_s30 + $0x58] sm:$0xff] %vm277_vm0, %v997_v42  ;;  %v992_v44 = vadd.f32 %v1136_v20, %v991_v43 }
 0x340   : > { %v1442_v45 = vpop.f32.mrf.mxu1 }
 0x341   : > { %1030 = vst.msk [vmem:[%s1809_s30 + $0x50] sm:$0xff] %vm277_vm0, %v992_v44  ;;  %v1007_v46 = vadd.f32 %v1442_v45, %v1136_v20 }
 0x342   : > { %v1001_v47 = vpop.f32.mrf.mxu1 }
 0x343   : > { %1033 = vst.msk [vmem:[%s1809_s30 + $0x68] sm:$0xff] %vm277_vm0, %v1007_v46  ;;  %v1002_v48 = vadd.f32 %v1136_v20, %v1001_v47 }
 0x344   : > { %v1445_v49 = vpop.f32.mrf.mxu1 }
 0x345   : > { %1032 = vst.msk [vmem:[%s1809_s30 + $0x60] sm:$0xff] %vm277_vm0, %v1002_v48  ;;  %v1017_v50 = vadd.f32 %v1445_v49, %v1136_v20 }
 0x346   : > { %v1011_v51 = vpop.f32.mrf.mxu1 }
 0x347   : > { %1035 = vst.msk [vmem:[%s1809_s30 + $0x78] sm:$0xff] %vm277_vm0, %v1017_v50  ;;  %v1012_v52 = vadd.f32 %v1136_v20, %v1011_v51 }
 0x349   : > { %1034 = vst.msk [vmem:[%s1809_s30 + $0x70] sm:$0xff] %vm277_vm0, %v1012_v52 }
 0x34a PF: > { %s16_s21 = sadd.s32 1, %s1492_s21  }
 0x34b   : > { %p13_p4 = scmp.ge.s32.totalorder %s16_s21, 4  }
 0x34d   :  { %15 = sbr.rel (!%p13_p4) target bundleno = 1 (0x1), region = 75 }

</bundles_post_ra>
